<compile_context>
chip_gen: v7x
topology: tpu7x:2x2x1
jax: 0.10.0
libtpu: 0.0.40
codegen_flags: <defaults>
</compile_context>

<pallas_src>
import jax
import jax.numpy as jnp
from jax import lax
from jax.experimental import pallas as pl
from jax.experimental.pallas import tpu as pltpu


def logreg_kernel(x_ref, w_ref, b_ref, o_ref):
    # x_ref: (TB, F) VMEM (native dtype), w_ref: (1, F) VMEM,
    # b_ref: (1, 1) SMEM scalar, o_ref: (1, TB) VMEM (lane-dense output).
    x = x_ref[...].astype(jnp.float32)
    w = w_ref[...].astype(jnp.float32)
    # z[0, i] = sum_f w[0, f] * x[i, f]  -- MXU dot, contraction on F of both
    # operands, result already lane-dense (1, TB); no transpose, no XLU reduce.
    z = lax.dot_general(w, x, (((1,), (1,)), ((), ())),
                        preferred_element_type=jnp.float32)
    z = z + b_ref[0, 0]
    # Numerically stable sigmoid via EUP tanh: sigmoid(z) = (1 + tanh(z/2)) / 2.
    o_ref[...] = 0.5 * (jnp.tanh(0.5 * z) + 1.0)


def _round_up(x, m):
    return ((x + m - 1) // m) * m


def logistic_regression_forward(x, weight, bias, *, tb_rows=None):
    """x: [B, F] (any float dtype); weight: [1, F] (nn.Linear layout); bias: [1]."""
    B, F = x.shape
    w = jnp.asarray(weight).reshape(1, F)
    b = jnp.asarray(bias, jnp.float32).reshape(1, 1)

    if tb_rows is None:
        # Size the batch tile by bytes: ~4 MiB of x per tile (8 MiB double-
        # buffered), accounting for lane padding of F to 128 in VMEM.
        lane_f = _round_up(F, 128)
        itemsize = jnp.dtype(x.dtype).itemsize
        budget_bytes = 4 * 1024 * 1024
        rows = max(128, budget_bytes // (lane_f * itemsize))
        tb = (rows // 128) * 128
    else:
        tb = tb_rows

    if B <= tb:
        # Single block equal to the full array dims (no (8,128) constraint).
        tb = B
        grid = (1,)
    else:
        # Multi-block grid: tb multiple of 128 keeps the x block rows 8-aligned
        # and the (1, tb) output block lane-aligned; tail block is masked by
        # Pallas (no wrapper-side padding of x).
        assert tb % 128 == 0, "tb_rows must be a multiple of 128 when B > tb"
        grid = (pl.cdiv(B, tb),)

    out = pl.pallas_call(
        logreg_kernel,
        out_shape=jax.ShapeDtypeStruct((1, B), jnp.float32),
        grid=grid,
        in_specs=[
            pl.BlockSpec((tb, F), lambda i: (i, 0)),             # x tile (native dtype)
            pl.BlockSpec((1, F), lambda i: (0, 0)),              # weight (resident)
            pl.BlockSpec((1, 1), lambda i: (0, 0),
                         memory_space=pltpu.MemorySpace.SMEM),   # bias scalar
        ],
        out_specs=pl.BlockSpec((1, tb), lambda i: (0, i)),       # lane-dense output
        compiler_params=pltpu.CompilerParams(
            dimension_semantics=("parallel",),
            vmem_limit_bytes=32 * 1024 * 1024,
        ),
    )(x, w, b)
    return out.reshape(B, 1)


if __name__ == "__main__":
    key = jax.random.PRNGKey(0)
    kx, kw, kb, kx2 = jax.random.split(key, 4)

    # Small shapes consistent with the module: batch=8, num_features=32.
    B, F = 8, 32
    bound = 1.0 / (F ** 0.5)
    x = jax.random.normal(kx, (B, F), dtype=jnp.float32)
    weight = jax.random.uniform(kw, (1, F), minval=-bound, maxval=bound,
                                dtype=jnp.float32)
    bias = jax.random.uniform(kb, (1,), minval=-bound, maxval=bound,
                              dtype=jnp.float32)

    out = logistic_regression_forward(x, weight, bias)
    out = jax.block_until_ready(out)
    ref = jax.nn.sigmoid(x @ weight.T + bias)
    assert out.shape == (B, 1)
    assert jnp.allclose(out, ref, atol=1e-5, rtol=1e-5)

    # Second case: multi-block grid with a masked tail block (no padding path).
    B2 = 300
    x2 = jax.random.normal(kx2, (B2, F), dtype=jnp.float32)
    out2 = logistic_regression_forward(x2, weight, bias, tb_rows=128)
    out2 = jax.block_until_ready(out2)
    ref2 = jax.nn.sigmoid(x2 @ weight.T + bias)
    assert out2.shape == (B2, 1)
    assert jnp.allclose(out2, ref2, atol=1e-5, rtol=1e-5)

    print("KERNEL_OK")
</pallas_src>

<mosaic_0001>
module attributes {stable_mosaic.version = 11 : i64} {
  func.func @logreg_kernel(%arg0: i32, %arg1: memref<8x32xf32, #tpu.memory_space<vmem>>, %arg2: memref<1x32xf32, #tpu.memory_space<vmem>>, %arg3: memref<1x1xf32, #tpu.memory_space<smem>>, %arg4: memref<1x8xf32, #tpu.memory_space<vmem>>) attributes {dimension_semantics = [#tpu.dimension_semantics<parallel>], iteration_bounds = array<i64: 1>, scalar_prefetch = 0 : i64, scratch_operands = 0 : i64, tpu.core_type = #tpu.core_type<tc>, window_params = [{transform_indices = @transform_0, window_bounds = array<i64: 8, 32>}, {pipeline_mode = #tpu.pipeline_mode<synchronous>, transform_indices = @transform_1, window_bounds = array<i64: 1, 32>}, {transform_indices = @transform_2, window_bounds = array<i64: 1, 1>}, {transform_indices = @transform_3, window_bounds = array<i64: 1, 8>}]} {
    %c0 = arith.constant 0 : index
    %c0_0 = arith.constant 0 : index
    %0 = vector.load %arg1[%c0, %c0_0] : memref<8x32xf32, #tpu.memory_space<vmem>>, vector<8x32xf32>
    %c0_1 = arith.constant 0 : index
    %c0_2 = arith.constant 0 : index
    %1 = vector.load %arg2[%c0_1, %c0_2] : memref<1x32xf32, #tpu.memory_space<vmem>>, vector<1x32xf32>
    %cst = arith.constant dense<0.000000e+00> : vector<1x8xf32>
    %2 = tpu.matmul %1, %0, %cst {dimension_numbers = #tpu.dot_dimension_numbers<[1], [1], [0], [0], [0, 0, 1, 0], [], []>} : vector<1x32xf32>, vector<8x32xf32>, vector<1x8xf32> -> vector<1x8xf32>
    %c0_3 = arith.constant 0 : index
    %c0_4 = arith.constant 0 : index
    %3 = memref.load %arg3[%c0_3, %c0_4] : memref<1x1xf32, #tpu.memory_space<smem>>
    %4 = vector.broadcast %3 : f32 to vector<1x8xf32>
    %5 = arith.addf %2, %4 : vector<1x8xf32>
    %cst_5 = arith.constant 5.000000e-01 : f32
    %6 = vector.broadcast %cst_5 : f32 to vector<1x8xf32>
    %7 = arith.mulf %6, %5 : vector<1x8xf32>
    %8 = math.tanh %7 : vector<1x8xf32>
    %cst_6 = arith.constant 1.000000e+00 : f32
    %9 = vector.broadcast %cst_6 : f32 to vector<1x8xf32>
    %10 = arith.addf %8, %9 : vector<1x8xf32>
    %cst_7 = arith.constant 5.000000e-01 : f32
    %11 = vector.broadcast %cst_7 : f32 to vector<1x8xf32>
    %12 = arith.mulf %11, %10 : vector<1x8xf32>
    %c0_8 = arith.constant 0 : index
    %c0_9 = arith.constant 0 : index
    %13 = vector.load %arg4[%c0_8, %c0_9] : memref<1x8xf32, #tpu.memory_space<vmem>>, vector<1x8xf32>
    tpu.vector_store %arg4[%c0_8, %c0_9], %12 {strides = array<i32>} : memref<1x8xf32, #tpu.memory_space<vmem>>, vector<1x8xf32>,
    return
  }
  func.func @transform_0(%arg0: i32) -> (i32, i32) {
    %c0_i32 = arith.constant 0 : i32
    %c0_i32_0 = arith.constant 0 : i32
    return %arg0, %c0_i32 : i32, i32
  }
  func.func @transform_1(%arg0: i32) -> (i32, i32) {
    %c0_i32 = arith.constant 0 : i32
    %c0_i32_0 = arith.constant 0 : i32
    %c0_i32_1 = arith.constant 0 : i32
    return %c0_i32, %c0_i32_0 : i32, i32
  }
  func.func @transform_2(%arg0: i32) -> (i32, i32) {
    %c0_i32 = arith.constant 0 : i32
    %c0_i32_0 = arith.constant 0 : i32
    %c0_i32_1 = arith.constant 0 : i32
    return %c0_i32, %c0_i32_0 : i32, i32
  }
  func.func @transform_3(%arg0: i32) -> (i32, i32) {
    %c0_i32 = arith.constant 0 : i32
    %c0_i32_0 = arith.constant 0 : i32
    return %c0_i32, %arg0 : i32, i32
  }
}

</mosaic_0001>

<bundles_post_ra>
// kernel: tpu_custom_call.1
= control target key start
LH: loop header
LB: loop body
LE: loop exit
PB: predicated region body
PF: predicated region fallthrough
CT: control target
= control target key end

     0   :  { %9 = vsyncpa [#allocation4], 0  ;;  %s247_s0 = inlined_call_operand.hbm [shape: f32[8,32], index: 0, kind: input, shape index: {}]   ;;  %s248_s1 = inlined_call_operand.vmem [shape: f32[1,32], index: 1, kind: input, shape index: {}]   ;;  %s249_s2 = inlined_call_operand.<no memory space> [shape: f32[1,1], index: 2, kind: input, shape index: {}]   ;;  %s250_s3 = inlined_call_operand.hbm [shape: f32[1,8], index: 3, kind: output, shape index: {}]  }
   0x1   :  { %10 = vsyncpa [#allocation5], 0  ;;  %s193_s12 = smov [#allocation3]   ;;  %s145_s16 = scalar_lea.hbm %s247_s0, 128 }
   0x2   :  { %s17_s13 = sshll.u32 %s193_s12, 4  ;;  %p146_p0 = scmp.ne.s32.totalorder %s247_s0, %s145_s16  ;;  %s18_s13 = int_to_ptr.vmem [resolvable:$true] %s17_s13 }
   0x3   :  { %p149_p1 = scmp.lt.u32.totalorder %s145_s16, %s247_s0 }
   0x5   :  { %p151_p2 = pnand %p149_p1, %p146_p0 }
   0x7   :  { %154 = shalt.err (!%p151_p2)
}
   0x8   :  { %s155_s21 = scalar_lea.vmem %s18_s13, 128  ;;  %p160_p4 = scmp.lt.s32.totalorder %s18_s13, %s18_s13 }
   0x9   :  { %p156_p3 = scmp.ne.s32.totalorder %s18_s13, %s155_s21  ;;  %p161_p5 = scmp.lt.s32.totalorder %s155_s21, %s155_s21 }
   0xb   :  { %p162_p6 = por %p161_p5, %p160_p4 }
   0xd   :  { %p163_p7 = pnand %p162_p6, %p156_p3 }
   0xf   :  { %166 = shalt.err (!%p163_p7)
}
  0x10   :  { %20 = dma.hbm_to_vmem [thread:$0]  %s247_s0, 128, %s18_s13, [#allocation4]  }
  0x11   :  { %189 = dma.done.wait [#allocation4], 128  }
  0x12   :  { %190 = vsyncadd [#allocation4], 4294967168  ;;  %v194_v0 = vmov 0.0   ;;  %vm195_vm0 = vmmov 0   ;;  %vm32_vm1 = vcmask 261120   ;;  %v28_v1 = vld [vmem:[#allocation3] sm:$0xff]  ;;  %v31_v3 = vstv %s249_s2 }
  0x13   :  { %134 = vmatprep.subr.mxu0 %v194_v0  ;;  %136 = vmatprep.mubr.msk.f32.mxu0 %vm195_vm0, %v194_v0  ;;  %v29_v2 = vld [vmem:[%s248_s1] sm:$0x1]  ;;  %s196_s0 = smov [#allocation6]   ;;  %vm113_vm2 = vcmask 57344  }
  0x14   :  { %135 = vmatpush3.xpose.msk.msra.mxu0 %vm32_vm1, %v28_v1  ;;  %s121_s28 = sshll.u32 %s196_s0, 4  ;;  %s122_s28 = int_to_ptr.vmem [resolvable:$true] %s121_s28 }
  0x15   :  { %s167_s29 = scalar_lea.vmem %s122_s28, 16  ;;  %s171_s1 = scalar_lea.vmem %s122_s28, 32 }
  0x16   :  { %p168_p8 = scmp.ne.s32.totalorder %s122_s28, %s167_s29  ;;  %p172_p9 = scmp.lt.s32.totalorder %s122_s28, %s122_s28 }
  0x17   :  { %137 = vmatmul.mubr.msk.f32.vlgmr.msra.gmra.mrb[0].mxu0 %vm32_vm1, %v29_v2  ;;  %p173_p10 = scmp.lt.s32.totalorder %s171_s1, %s167_s29 }
  0x19   :  { %p174_p11 = por %p173_p10, %p172_p9 }
  0x1b   :  { %p175_p12 = pnand %p174_p11, %p168_p8 }
  0xea   :  { %v105_v4 = vpop.f32.mrb[0].mxu0 }
  0xeb   :  { %v106_v5 = vadd.f32 %v105_v4, %v31_v3  ;;  %v138_v6 = vpop.f32.mrb[1].mxu0 }
  0xed   :  { %v109_v7 = vmul.f32 0.5, %v106_v5 }
  0xef   :  { %143 = vtanh.f32 %v109_v7 }
  0xf9   :  { %v144_v8 = vpop.eup %143 }
  0xfa   :  { %v111_v9 = vadd.f32 1.0, %v144_v8 }
  0xfc   :  { %v112_v10 = vmul.f32 0.5, %v111_v9 }
  0xfe   :  { %114 = vst.msk [vmem:[#allocation6] sm:$0x1] %vm113_vm2, %v112_v10 }
  0xff   :  { %178 = shalt.err (!%p175_p12)
}
 0x100   :  { %s179_s4 = scalar_lea.hbm %s250_s3, 16 }
 0x101   :  { %p180_p13 = scmp.ne.s32.totalorder %s250_s3, %s179_s4  ;;  %p183_p0 = scmp.lt.u32.totalorder %s179_s4, %s250_s3 }
 0x103   :  { %p185_p1 = pnand %p183_p0, %p180_p13 }
 0x105   :  { %188 = shalt.err (!%p185_p1)
}
 0x106   :  { %124 = dma.vmem_to_hbm [thread:$0]  %s122_s28, 16, %s250_s3, [#allocation5]  }
 0x107   :  { %191 = dma.done.wait [#allocation5], 16  }
 0x108   :  { %192 = vsyncadd [#allocation5], 4294967280 }
 0x109   :  { %128 = vsyncpa [#allocation4], 1 }
 0x10a   :  { %129 = vsyncpa [#allocation5], 1 }

</bundles_post_ra>
